<compile_context>
chip_gen: v7x
topology: tpu7x:2x2x1
jax: 0.10.0
libtpu: 0.0.40
codegen_flags: <defaults>
</compile_context>

<pallas_src>
import math

import jax
import jax.numpy as jnp
from jax.experimental import pallas as pl
from jax.experimental.pallas import tpu as pltpu


def _affine_kernel(x_ref, w_ref, b_ref, o_ref):
    # x_ref: [TM, 2*fold] folded coordinate rows
    # w_ref: [2*fold, fold*rnn] block-diagonal replication of W_eff
    # b_ref: [1, fold*rnn]     tiled b_eff
    h = jnp.dot(x_ref[...], w_ref[...], preferred_element_type=jnp.float32)
    o_ref[...] = (h + b_ref[...]).astype(o_ref.dtype)


def _round_up(x, m):
    return ((x + m - 1) // m) * m


def encoder_coords_forward(coords, params, *, tile_m=2048):
    """coords: [B, N, 2]. Returns [B, N, rnn_size] (same math as the 3 k=1 convs)."""
    w1, b1, w2, b2, w3, b3 = params
    B, N, C = coords.shape
    assert C == 2
    rnn_size = w3.shape[1]

    # ---- Collapse the 3 affine layers into one (tiny host-side matmuls).
    w23 = w2 @ w3                              # [rnn, rnn]
    w_eff = w1 @ w23                           # [2, rnn]
    b_eff = b1 @ w23 + b2 @ w3 + b3            # [1, rnn]

    # ---- Fold `fold` rows per output row so the kernel output is lane-dense
    #      (last dim a multiple of 128).  Row-major layouts make the fold /
    #      un-fold pure reshapes.
    fold = math.lcm(rnn_size, 128) // rnn_size
    wout = fold * rnn_size                                          # multiple of 128
    w_blk = jnp.kron(jnp.eye(fold, dtype=w_eff.dtype), w_eff)       # [2*fold, wout]
    b_blk = jnp.tile(b_eff, (1, fold))                              # [1, wout]

    M = B * N
    M_pad = _round_up(M, fold)                 # at most fold-1 extra rows
    x = coords.reshape(M, 2)
    if M_pad != M:
        x = jnp.pad(x, ((0, M_pad - M), (0, 0)))
    mf = M_pad // fold
    x_view = x.reshape(mf, 2 * fold)

    # Folded rows per grid step: big for streaming, clamped (sublane-aligned)
    # for tiny problems.  Ragged last block is handled by Pallas (masked store).
    tm = min(tile_m, _round_up(mf, 8))
    grid = (pl.cdiv(mf, tm),)

    out = pl.pallas_call(
        _affine_kernel,
        out_shape=jax.ShapeDtypeStruct((mf, wout), coords.dtype),
        grid=grid,
        in_specs=[
            pl.BlockSpec((tm, 2 * fold), lambda i: (i, 0)),          # x tile
            pl.BlockSpec((2 * fold, wout), lambda i: (0, 0)),        # W_blk (const)
            pl.BlockSpec((1, wout), lambda i: (0, 0)),               # b_blk (const)
        ],
        out_specs=pl.BlockSpec((tm, wout), lambda i: (i, 0)),
        compiler_params=pltpu.CompilerParams(
            dimension_semantics=("parallel",)),
    )(x_view, w_blk, b_blk)

    # Un-fold: [mf, fold*rnn] row-major == [M_pad, rnn] row-major (free view).
    return out.reshape(M_pad, rnn_size)[:M].reshape(B, N, rnn_size)


def init_params(key, rnn_size, intermediate_size):
    """PyTorch Conv1d default init: U(-k, k), k = 1/sqrt(fan_in).

    Weights stored as [in, out] (transposed from Conv1d's [out, in, 1]);
    biases as [1, out].
    """
    ks = jax.random.split(key, 6)

    def uinit(k, shape, fan_in):
        bound = 1.0 / jnp.sqrt(fan_in)
        return jax.random.uniform(k, shape, jnp.float32, -bound, bound)

    w1 = uinit(ks[0], (2, rnn_size), 2.0)
    b1 = uinit(ks[1], (1, rnn_size), 2.0)
    w2 = uinit(ks[2], (rnn_size, intermediate_size), float(rnn_size))
    b2 = uinit(ks[3], (1, intermediate_size), float(rnn_size))
    w3 = uinit(ks[4], (intermediate_size, rnn_size), float(intermediate_size))
    b3 = uinit(ks[5], (1, rnn_size), float(intermediate_size))
    return (w1, b1, w2, b2, w3, b3)


def reference_forward(coords, params):
    """Plain-JAX reference of the original 3-matmul chain."""
    w1, b1, w2, b2, w3, b3 = params
    h = coords @ w1 + b1
    h = h @ w2 + b2
    h = h @ w3 + b3
    return h


if __name__ == "__main__":
    # Small shapes consistent with the module: batch=2, seq(num nodes)=8,
    # rnn_size=32, intermediate_size=64.  `size` is unused in forward.
    B, N = 2, 8
    rnn_size, intermediate_size = 32, 64

    key = jax.random.PRNGKey(0)
    k_coords, k_params = jax.random.split(key)

    coords = jax.random.uniform(k_coords, (B, N, 2), jnp.float32)
    params = init_params(k_params, rnn_size, intermediate_size)

    out = encoder_coords_forward(coords, params)
    out = jax.block_until_ready(out)

    ref = reference_forward(coords, params)
    assert out.shape == (B, N, rnn_size), out.shape
    # Collapsed-weight math differs from the 3-matmul chain only by fp32
    # rounding/associativity -> slightly looser tolerance.
    assert jnp.allclose(out, ref, atol=1e-4, rtol=1e-4), "mismatch vs reference"

    print("KERNEL_OK")
</pallas_src>

<mosaic_0001>
module attributes {stable_mosaic.version = 11 : i64} {
  func.func @_affine_kernel(%arg0: i32, %arg1: memref<8x8xf32, #tpu.memory_space<vmem>>, %arg2: memref<8x128xf32, #tpu.memory_space<vmem>>, %arg3: memref<1x128xf32, #tpu.memory_space<vmem>>, %arg4: memref<8x128xf32, #tpu.memory_space<vmem>>) attributes {dimension_semantics = [#tpu.dimension_semantics<parallel>], iteration_bounds = array<i64: 1>, scalar_prefetch = 0 : i64, scratch_operands = 0 : i64, tpu.core_type = #tpu.core_type<tc>, window_params = [{transform_indices = @transform_0, window_bounds = array<i64: 8, 8>}, {pipeline_mode = #tpu.pipeline_mode<synchronous>, transform_indices = @transform_1, window_bounds = array<i64: 8, 128>}, {pipeline_mode = #tpu.pipeline_mode<synchronous>, transform_indices = @transform_2, window_bounds = array<i64: 1, 128>}, {transform_indices = @transform_3, window_bounds = array<i64: 8, 128>}]} {
    %c0 = arith.constant 0 : index
    %c0_0 = arith.constant 0 : index
    %0 = vector.load %arg1[%c0, %c0_0] : memref<8x8xf32, #tpu.memory_space<vmem>>, vector<8x8xf32>
    %c0_1 = arith.constant 0 : index
    %c0_2 = arith.constant 0 : index
    %1 = vector.load %arg2[%c0_1, %c0_2] : memref<8x128xf32, #tpu.memory_space<vmem>>, vector<8x128xf32>
    %cst = arith.constant dense<0.000000e+00> : vector<8x128xf32>
    %2 = tpu.matmul %0, %1, %cst {dimension_numbers = #tpu.dot_dimension_numbers<[1], [0], [0], [1], [0, 0, 1, 1], [], []>} : vector<8x8xf32>, vector<8x128xf32>, vector<8x128xf32> -> vector<8x128xf32>
    %c0_3 = arith.constant 0 : index
    %c0_4 = arith.constant 0 : index
    %3 = vector.load %arg3[%c0_3, %c0_4] : memref<1x128xf32, #tpu.memory_space<vmem>>, vector<1x128xf32>
    %4 = vector.broadcast %3 : vector<1x128xf32> to vector<8x128xf32>
    %5 = arith.addf %2, %4 : vector<8x128xf32>
    %c0_5 = arith.constant 0 : index
    %c0_6 = arith.constant 0 : index
    %6 = vector.load %arg4[%c0_5, %c0_6] : memref<8x128xf32, #tpu.memory_space<vmem>>, vector<8x128xf32>
    tpu.vector_store %arg4[%c0_5, %c0_6], %5 {strides = array<i32>} : memref<8x128xf32, #tpu.memory_space<vmem>>, vector<8x128xf32>,
    return
  }
  func.func @transform_0(%arg0: i32) -> (i32, i32) {
    %c0_i32 = arith.constant 0 : i32
    %c0_i32_0 = arith.constant 0 : i32
    return %arg0, %c0_i32 : i32, i32
  }
  func.func @transform_1(%arg0: i32) -> (i32, i32) {
    %c0_i32 = arith.constant 0 : i32
    %c0_i32_0 = arith.constant 0 : i32
    %c0_i32_1 = arith.constant 0 : i32
    return %c0_i32, %c0_i32_0 : i32, i32
  }
  func.func @transform_2(%arg0: i32) -> (i32, i32) {
    %c0_i32 = arith.constant 0 : i32
    %c0_i32_0 = arith.constant 0 : i32
    %c0_i32_1 = arith.constant 0 : i32
    return %c0_i32, %c0_i32_0 : i32, i32
  }
  func.func @transform_3(%arg0: i32) -> (i32, i32) {
    %c0_i32 = arith.constant 0 : i32
    %c0_i32_0 = arith.constant 0 : i32
    return %arg0, %c0_i32 : i32, i32
  }
}

</mosaic_0001>

<bundles_post_ra>
// kernel: tpu_custom_call.1
= control target key start
LH: loop header
LB: loop body
LE: loop exit
PB: predicated region body
PF: predicated region fallthrough
CT: control target
= control target key end

     0   :  { %8 = vsyncpa [#allocation3], 0  ;;  %s303_s0 = inlined_call_operand.hbm [shape: f32[4,8], index: 0, kind: input, shape index: {}]   ;;  %s304_s1 = inlined_call_operand.hbm [shape: f32[8,128], index: 1, kind: input, shape index: {}]   ;;  %s305_s2 = inlined_call_operand.vmem [shape: f32[1,128], index: 2, kind: input, shape index: {}]   ;;  %s306_s3 = inlined_call_operand.hbm [shape: f32[4,128], index: 3, kind: output, shape index: {}]  }
   0x1   :  { %9 = vsyncpa [#allocation6], 0 }
   0x2   :  { %10 = vsyncpa [#allocation4], 0 }
   0x3   :  { %15 = vsyncadd [#allocation3], 64  ;;  %s231_s12 = smov [#allocation2]   ;;  %s159_s16 = scalar_lea.hbm %s303_s0, 64 }
   0x4   :  { %s16_s13 = sshll.u32 %s231_s12, 4  ;;  %p160_p0 = scmp.ne.s32.totalorder %s303_s0, %s159_s16  ;;  %s17_s13 = int_to_ptr.vmem [resolvable:$true] %s16_s13 }
   0x5   :  { %p163_p1 = scmp.lt.u32.totalorder %s159_s16, %s303_s0 }
   0x7   :  { %p165_p2 = pnand %p163_p1, %p160_p0 }
   0x9   :  { %168 = shalt.err (!%p165_p2)
}
   0xa   :  { %s169_s21 = scalar_lea.vmem %s17_s13, 64  ;;  %s173_s22 = scalar_lea.vmem %s17_s13, 128 }
   0xb   :  { %p170_p3 = scmp.ne.s32.totalorder %s17_s13, %s169_s21  ;;  %p174_p4 = scmp.lt.s32.totalorder %s17_s13, %s17_s13 }
   0xc   :  { %p175_p5 = scmp.lt.s32.totalorder %s173_s22, %s169_s21 }
   0xe   :  { %p176_p6 = por %p175_p5, %p174_p4 }
  0x10   :  { %p177_p7 = pnand %p176_p6, %p170_p3 }
  0x12   :  { %180 = shalt.err (!%p177_p7)
}
  0x13   :  { %s232_s23 = smov 64   ;;  %s233_s24 = smov 4  }
  0x14   :  { %22 = dma.hbm_to_vmem [thread:$0]  %s303_s0, 64, %s17_s13, [#allocation3], %s232_s23, %s232_s23, %s233_s24  }
  0x15   :  { %s234_s27 = smov [#allocation5]   ;;  %s181_s4 = scalar_lea.hbm %s304_s1, 128 }
  0x16   :  { %s29_s28 = sshll.u32 %s234_s27, 4  ;;  %p182_p8 = scmp.ne.s32.totalorder %s304_s1, %s181_s4  ;;  %s30_s28 = int_to_ptr.vmem [resolvable:$true] %s29_s28 }
  0x17   :  { %p185_p9 = scmp.lt.u32.totalorder %s181_s4, %s304_s1 }
  0x19   :  { %p187_p10 = pnand %p185_p9, %p182_p8 }
  0x1b   :  { %190 = shalt.err (!%p187_p10)
}
  0x1c   :  { %s191_s9 = scalar_lea.vmem %s30_s28, 128  ;;  %p196_p12 = scmp.lt.s32.totalorder %s30_s28, %s30_s28 }
  0x1d   :  { %p192_p11 = scmp.ne.s32.totalorder %s30_s28, %s191_s9  ;;  %p197_p13 = scmp.lt.s32.totalorder %s191_s9, %s191_s9 }
  0x1f   :  { %p198_p0 = por %p197_p13, %p196_p12 }
  0x21   :  { %p199_p1 = pnand %p198_p0, %p192_p11 }
  0x23   :  { %202 = shalt.err (!%p199_p1)
}
  0x24   :  { %32 = dma.hbm_to_vmem [thread:$0]  %s304_s1, 128, %s30_s28, [#allocation6]  }
  0x25   :  { %225 = dma.done.wait [#allocation3], 128  }
  0x26   :  { %226 = vsyncadd [#allocation3], 4294967168 }
  0x27   :  { %227 = dma.done.wait [#allocation6], 128  }
  0x28   :  { %228 = vsyncadd [#allocation6], 4294967168  ;;  %v235_v0 = vmov 0.0   ;;  %vm236_vm0 = vmmov 0   ;;  %vm50_vm1 = vcmask 64512   ;;  %v42_v1 = vld [vmem:[#allocation5] sm:$0xff] }
  0x29   :  { %147 = vmatprep.subr.mxu0 %v235_v0  ;;  %149 = vmatprep.mubr.msk.f32.mxu0 %vm236_vm0, %v235_v0  ;;  %v41_v2 = vld [vmem:[#allocation2] sm:$0xff] }
  0x2a   :  { %148 = vmatpush3.msra.mxu0 %v42_v1  ;;  %v143_v3 = vld [vmem:[%s305_s2] ss:$0 sm:$0xff] }
  0x2b   :  { %150 = vmatmul.mubr.msk.f32.vlgmr.msra.gmra.mrb[0].mxu0 %vm50_vm1, %v41_v2 }
  0xfe   :  { %v120_v4 = vpop.f32.mrb[0].mxu0 }
  0xff   :  { %v121_v5 = vadd.f32 %v143_v3, %v120_v4  ;;  %v151_v6 = vpop.f32.mrb[1].mxu0 }
 0x101   :  { %124 = vst [vmem:[#allocation7] sm:$0xff] %v121_v5 }
 0x102   :  { %129 = vsyncadd [#allocation4], 64  ;;  %s237_s1 = smov [#allocation7]  }
 0x103   :  { %s130_s13 = sshll.u32 %s237_s1, 4  ;;  %s131_s13 = int_to_ptr.vmem [resolvable:$true] %s130_s13 }
 0x104   :  { %s203_s14 = scalar_lea.vmem %s131_s13, 64  ;;  %s207_s15 = scalar_lea.vmem %s131_s13, 128 }
 0x105   :  { %p204_p2 = scmp.ne.s32.totalorder %s131_s13, %s203_s14  ;;  %p208_p3 = scmp.lt.s32.totalorder %s131_s13, %s131_s13 }
 0x106   :  { %p209_p4 = scmp.lt.s32.totalorder %s207_s15, %s203_s14 }
 0x108   :  { %p210_p5 = por %p209_p4, %p208_p3 }
 0x10a   :  { %p211_p6 = pnand %p210_p5, %p204_p2 }
 0x10c   :  { %214 = shalt.err (!%p211_p6)
}
 0x10d   :  { %s215_s2 = scalar_lea.hbm %s306_s3, 64 }
 0x10e   :  { %p216_p7 = scmp.ne.s32.totalorder %s306_s3, %s215_s2  ;;  %p219_p8 = scmp.lt.u32.totalorder %s215_s2, %s306_s3 }
 0x110   :  { %p221_p9 = pnand %p219_p8, %p216_p7 }
 0x112   :  { %224 = shalt.err (!%p221_p9)
}
 0x113   :  { %136 = dma.vmem_to_hbm [thread:$0]  %s131_s13, 64, %s306_s3, [#allocation4], %s232_s23, %s232_s23, %s233_s24  }
 0x114   :  { %229 = dma.done.wait [#allocation4], 128  }
 0x115   :  { %230 = vsyncadd [#allocation4], 4294967168 }
 0x116   :  { %140 = vsyncpa [#allocation3], 1 }
 0x117   :  { %141 = vsyncpa [#allocation6], 1 }
 0x118   :  { %142 = vsyncpa [#allocation4], 1 }

</bundles_post_ra>
